<compile_context>
chip_gen: v5e
topology: v5e:2x2
jax: 0.10.0
libtpu: 0.0.40
codegen_flags: <defaults>
</compile_context>

<pallas_src>
import jax
import jax.numpy as jnp
from jax.experimental import pallas as pl
from jax.experimental.pallas import tpu as pltpu


def _linear_relu_kernel(x_ref, w_ref, b_ref, o_ref):
    # x_ref: (TB, D) VMEM batch tile
    # w_ref: (1, D)  VMEM, resident across all grid steps
    # b_ref: (1, 1)  SMEM scalar
    # o_ref: (1, TB) VMEM, lane-dense output tile
    x = x_ref[...].astype(jnp.float32)
    w = w_ref[...].astype(jnp.float32)
    # (1, D) . (TB, D) contracting D on both -> (1, TB)
    y = jax.lax.dot_general(
        w, x,
        dimension_numbers=(((1,), (1,)), ((), ())),
        preferred_element_type=jnp.float32,
    )
    y = y + b_ref[0, 0]
    o_ref[...] = jnp.maximum(y, 0.0).astype(o_ref.dtype)


def linear_regression_forward(x, weight, bias, *, block_b=512):
    """ReLU(x @ weight.T + bias).  x: (B, D), weight: (1, D), bias: (1,) -> (B, 1)."""
    B, D = x.shape
    out_dtype = x.dtype

    # Batch tile: multiples of 512 satisfy both the sublane (8) and lane (128)
    # divisibility requirements; small batches fall back to a single full tile.
    if B >= block_b:
        TB = block_b
    else:
        TB = -(-B // 8) * 8  # round up to a sublane multiple
    B_pad = -(-B // TB) * TB
    if B_pad != B:
        x = jnp.pad(x, ((0, B_pad - B), (0, 0)))
    grid = (B_pad // TB,)

    w_row = weight.reshape(1, D)                 # keep lane-dense (1, D) row
    b2 = bias.reshape(1, 1).astype(jnp.float32)  # SMEM scalar

    itemsize = jnp.dtype(x.dtype).itemsize
    cost = pl.CostEstimate(
        flops=2 * B_pad * D,
        transcendentals=0,
        bytes_accessed=B_pad * D * itemsize + D * 4 + B_pad * itemsize,
    )

    # VMEM budget: double-buffered x tile + double-buffered output + weight,
    # with generous headroom but capped below every generation's scoped limit.
    vmem_needed = 2 * TB * D * itemsize + 2 * TB * 4 + D * 4
    vmem_limit = int(min(max(4 * vmem_needed, 16 * 1024 * 1024),
                         32 * 1024 * 1024))

    out = pl.pallas_call(
        _linear_relu_kernel,
        out_shape=jax.ShapeDtypeStruct((1, B_pad), out_dtype),
        grid=grid,
        in_specs=[
            pl.BlockSpec((TB, D), lambda i: (i, 0)),             # batch tile
            pl.BlockSpec((1, D), lambda i: (0, 0)),              # resident weight
            pl.BlockSpec(memory_space=pltpu.MemorySpace.SMEM),   # scalar bias
        ],
        out_specs=pl.BlockSpec((1, TB), lambda i: (0, i)),       # lane-dense out
        compiler_params=pltpu.CompilerParams(
            dimension_semantics=("parallel",),
            vmem_limit_bytes=vmem_limit,
        ),
        cost_estimate=cost,
    )(x, w_row, b2)

    # (1, B_pad) -> (B, 1); drop any batch padding.
    return out.reshape(B_pad, 1)[:B]


if __name__ == "__main__":
    key = jax.random.PRNGKey(0)
    k_x, k_w, k_b = jax.random.split(key, 3)

    batch, input_dim = 8, 32

    x = jax.random.normal(k_x, (batch, input_dim), dtype=jnp.float32)

    # Deterministic init mimicking nn.Linear default: U(-1/sqrt(D), 1/sqrt(D))
    bound = 1.0 / (input_dim ** 0.5)
    weight = jax.random.uniform(k_w, (1, input_dim), minval=-bound, maxval=bound,
                                dtype=jnp.float32)
    bias = jax.random.uniform(k_b, (1,), minval=-bound, maxval=bound,
                              dtype=jnp.float32)

    out = linear_regression_forward(x, weight, bias)
    out = jax.block_until_ready(out)

    # Reference check in plain JAX.
    ref = jnp.maximum(x @ weight.T + bias, 0.0)
    assert out.shape == (batch, 1)
    assert jnp.allclose(out, ref, atol=1e-5, rtol=1e-5)

    print("KERNEL_OK")
</pallas_src>

<mosaic_0001>
module attributes {stable_mosaic.version = 11 : i64} {
  func.func @_linear_relu_kernel(%arg0: i32, %arg1: memref<8x32xf32, #tpu.memory_space<vmem>>, %arg2: memref<1x32xf32, #tpu.memory_space<vmem>>, %arg3: memref<1x1xf32, #tpu.memory_space<smem>>, %arg4: memref<1x8xf32, #tpu.memory_space<vmem>>) attributes {dimension_semantics = [#tpu.dimension_semantics<parallel>], iteration_bounds = array<i64: 1>, scalar_prefetch = 0 : i64, scratch_operands = 0 : i64, tpu.core_type = #tpu.core_type<tc>, window_params = [{transform_indices = @transform_0, window_bounds = array<i64: 8, 32>}, {pipeline_mode = #tpu.pipeline_mode<synchronous>, transform_indices = @transform_1, window_bounds = array<i64: 1, 32>}, {transform_indices = @transform_2, window_bounds = array<i64: 1, 1>}, {transform_indices = @transform_3, window_bounds = array<i64: 1, 8>}]} {
    %c0 = arith.constant 0 : index
    %c0_0 = arith.constant 0 : index
    %0 = vector.load %arg1[%c0, %c0_0] : memref<8x32xf32, #tpu.memory_space<vmem>>, vector<8x32xf32>
    %c0_1 = arith.constant 0 : index
    %c0_2 = arith.constant 0 : index
    %1 = vector.load %arg2[%c0_1, %c0_2] : memref<1x32xf32, #tpu.memory_space<vmem>>, vector<1x32xf32>
    %cst = arith.constant dense<0.000000e+00> : vector<1x8xf32>
    %2 = tpu.matmul %1, %0, %cst {dimension_numbers = #tpu.dot_dimension_numbers<[1], [1], [0], [0], [0, 0, 1, 0], [], []>} : vector<1x32xf32>, vector<8x32xf32>, vector<1x8xf32> -> vector<1x8xf32>
    %c0_3 = arith.constant 0 : index
    %c0_4 = arith.constant 0 : index
    %3 = memref.load %arg3[%c0_3, %c0_4] : memref<1x1xf32, #tpu.memory_space<smem>>
    %4 = vector.broadcast %3 : f32 to vector<1x8xf32>
    %5 = arith.addf %2, %4 : vector<1x8xf32>
    %cst_5 = arith.constant 0.000000e+00 : f32
    %6 = vector.broadcast %cst_5 : f32 to vector<1x8xf32>
    %7 = arith.maximumf %5, %6 : vector<1x8xf32>
    %c0_6 = arith.constant 0 : index
    %c0_7 = arith.constant 0 : index
    %8 = vector.load %arg4[%c0_6, %c0_7] : memref<1x8xf32, #tpu.memory_space<vmem>>, vector<1x8xf32>
    tpu.vector_store %arg4[%c0_6, %c0_7], %7 {strides = array<i32>} : memref<1x8xf32, #tpu.memory_space<vmem>>, vector<1x8xf32>,
    return
  }
  func.func @transform_0(%arg0: i32) -> (i32, i32) {
    %c0_i32 = arith.constant 0 : i32
    %c0_i32_0 = arith.constant 0 : i32
    return %arg0, %c0_i32 : i32, i32
  }
  func.func @transform_1(%arg0: i32) -> (i32, i32) {
    %c0_i32 = arith.constant 0 : i32
    %c0_i32_0 = arith.constant 0 : i32
    %c0_i32_1 = arith.constant 0 : i32
    return %c0_i32, %c0_i32_0 : i32, i32
  }
  func.func @transform_2(%arg0: i32) -> (i32, i32) {
    %c0_i32 = arith.constant 0 : i32
    %c0_i32_0 = arith.constant 0 : i32
    %c0_i32_1 = arith.constant 0 : i32
    return %c0_i32, %c0_i32_0 : i32, i32
  }
  func.func @transform_3(%arg0: i32) -> (i32, i32) {
    %c0_i32 = arith.constant 0 : i32
    %c0_i32_0 = arith.constant 0 : i32
    return %c0_i32, %arg0 : i32, i32
  }
}

</mosaic_0001>

<bundles_post_ra>
// kernel: tpu_custom_call.1
= control target key start
LH: loop header
LB: loop body
LE: loop exit
PB: predicated region body
PF: predicated region fallthrough
CT: control target
= control target key end

     0   :  { %9 = vsyncpa [#allocation4], 0  ;;  %s171_s0 = inlined_call_operand.hbm [shape: f32[8,32], index: 0, kind: input, shape index: {}]   ;;  %s172_s1 = inlined_call_operand.vmem [shape: f32[1,32], index: 1, kind: input, shape index: {}]   ;;  %s173_s2 = inlined_call_operand.<no memory space> [shape: f32[1,1], index: 2, kind: input, shape index: {}]   ;;  %s174_s3 = inlined_call_operand.hbm [shape: f32[1,8], index: 3, kind: output, shape index: {}]  }
   0x1   :  { %10 = vsyncpa [#allocation5], 0  ;;  %s16_s14 = sshll.u32 %s171_s0, 4  ;;  %s137_s15 = smov [#allocation3]   ;;  %s17_s14 = int_to_ptr.hbm [resolvable:$true] %s16_s14 }
   0x2   :  { %s18_s16 = sshll.u32 %s137_s15, 4  ;;  %s19_s16 = int_to_ptr.vmem [resolvable:$true] %s18_s16 }
   0x3   :  { %21 = dma.hbm_to_vmem [thread:$0]  %s17_s14, 128, %s19_s16, [#allocation4]  }
   0x4   :  { %133 = dma.done.wait [#allocation4], 128  }
   0x5   :  { %134 = vsyncadd [#allocation4], 4294967168  ;;  %vm34_vm0 = vcmask 261120   ;;  %v30_v0 = vld [vmem:[#allocation3] sm:$0xff]  ;;  %v33_v2 = vstv %s173_s2  ;;  %s138_s0 = smov [#allocation6]   ;;  %s71_s24 = sshll.u32 %s174_s3, 4  ;;  %s72_s24 = int_to_ptr.hbm [resolvable:$true] %s71_s24 }
   0x6   :  { %81 = vmatpush.xpose.msk.msra.mxu0 %vm34_vm0, %v30_v0  ;;  %v31_v1 = vld [vmem:[%s172_s1] sm:$0x1]  ;;  %s69_s21 = sshll.u32 %s138_s0, 4  ;;  %vm62_vm1 = vcmask 57344   ;;  %s70_s21 = int_to_ptr.vmem [resolvable:$true] %s69_s21 }
   0x9   :  { %82 = vmatmul.msk.f32.vlgmr.msra.gmra.mxu0 %vm34_vm0, %v31_v1 }
  0x86   :  { %v58_v3 = vpop.f32.mrf.mxu0 }
  0x87   :  { %v59_v4 = vadd.f32 %v58_v3, %v33_v2 }
  0x89   :  { %v61_v5 = vmax.f32 %v59_v4, 0.0 }
  0x8b   :  { %63 = vst.msk [vmem:[#allocation6] sm:$0x1] %vm62_vm1, %v61_v5 }
  0x8c   :  { %74 = dma.vmem_to_hbm [thread:$0]  %s70_s21, 16, %s72_s24, [#allocation5]  }
  0x8d   :  { %135 = dma.done.wait [#allocation5], 16  }
  0x8e   :  { %136 = vsyncadd [#allocation5], 4294967280 }
  0x8f   :  { %79 = vsyncpa [#allocation4], 1 }
  0x90   :  { %80 = vsyncpa [#allocation5], 1 }

</bundles_post_ra>
